<compile_context>
chip_gen: v7x
topology: tpu7x:2x2x1
jax: 0.10.0
libtpu: 0.0.40
codegen_flags: <defaults>
</compile_context>

<pallas_src>
import functools

import jax
import jax.numpy as jnp
import numpy as np
from jax.experimental import pallas as pl
from jax.experimental.pallas import tpu as pltpu


# ----------------------------- Pallas kernel ---------------------------------
def postres_kernel(*refs, has_shortcut, count, L, eps=1e-5):
    """Activations are (C_pad, Wp) slabs: channels on sublanes, batch*length on lanes.

    count = N*L real lanes; lanes >= count are zero alignment padding.  Column j of the
    slab holds sample n = j // L, position t = j % L.
    """
    if has_shortcut:
        (x_ref, w1l_ref, w1c_ref, w1r_ref, g1_ref, be1_ref,
         w2l_ref, w2c_ref, w2r_ref, g2_ref, be2_ref,
         gs_ref, bes_ref, out_ref) = refs
    else:
        (x_ref, w1l_ref, w1c_ref, w1r_ref, g1_ref, be1_ref,
         w2l_ref, w2c_ref, w2r_ref, g2_ref, be2_ref, out_ref) = refs
        gs_ref = bes_ref = None

    x = x_ref[...]                       # (Cin_p, Wp) compute dtype (f32 or bf16)
    Wp = x.shape[1]
    Cout_p = g1_ref.shape[0]
    inv_count = 1.0 / float(count)

    # --- boundary / validity masks built in-kernel (no HBM streams). ---
    pos = jax.lax.broadcasted_iota(jnp.int32, (1, Wp), 1)
    in_sample = pos < count                                     # 0 on alignment-pad lanes
    lm = jnp.logical_and(in_sample, pos % L != 0)               # has a left neighbour
    rm = jnp.logical_and(in_sample, pos % L != (L - 1))         # has a right neighbour

    def shifted(h):
        # h[:, j-1] / h[:, j+1] via XLU lane rotations; sample edges (and pad lanes)
        # are zeroed so each sample sees zero-padded k=3 "same" convolution.
        zero = jnp.zeros((), h.dtype)
        left = jnp.where(lm, pltpu.roll(h, 1, axis=1), zero)        # h[:, j-1]
        right = jnp.where(rm, pltpu.roll(h, Wp - 1, axis=1), zero)  # h[:, j+1]
        return left, right

    def bn_affine(y, g, be):
        # Training-mode BatchNorm1d stats over (batch, length) == lanes, biased variance.
        # Pad lanes of y are exactly 0, so full-slab sums equal sums over real lanes.
        s = jnp.sum(y, axis=1, keepdims=True)
        s2 = jnp.sum(y * y, axis=1, keepdims=True)
        mean = s * inv_count
        var = jnp.maximum(s2 * inv_count - mean * mean, 0.0)   # guard cancellation
        a = g * jax.lax.rsqrt(var + eps)                        # EUP rsqrt
        return a, be - mean * a                                 # y*a + b  ==  (y-mean)*a+be

    # --- conv1 (three accumulating tap dots) with the 1x1 shortcut fused into the
    #     centre-tap matmul (rows [Cout_p:] of w1c are the shortcut weights). ---
    xl, xr = shifted(x)
    yc = jnp.dot(w1c_ref[...], x, preferred_element_type=jnp.float32)
    if has_shortcut:
        y1 = yc[:Cout_p]
        ysc = yc[Cout_p:]
    else:
        y1 = yc
        ysc = None
    y1 = y1 + jnp.dot(w1l_ref[...], xl, preferred_element_type=jnp.float32)
    y1 = y1 + jnp.dot(w1r_ref[...], xr, preferred_element_type=jnp.float32)

    # --- bn1 (affine) -> ReLU.  Pad lanes forced to exact 0 so conv2/bn2 stats stay
    #     clean; single h1 slab kept in the compute dtype. ---
    a1, b1 = bn_affine(y1, g1_ref[...], be1_ref[...])
    h1 = jnp.where(in_sample, jnp.maximum(y1 * a1 + b1, 0.0), 0.0).astype(x.dtype)

    # --- conv2 -> bn2 ---
    hl, hr = shifted(h1)
    y2 = jnp.dot(w2c_ref[...], h1, preferred_element_type=jnp.float32)
    y2 = y2 + jnp.dot(w2l_ref[...], hl, preferred_element_type=jnp.float32)
    y2 = y2 + jnp.dot(w2r_ref[...], hr, preferred_element_type=jnp.float32)
    a2, b2 = bn_affine(y2, g2_ref[...], be2_ref[...])

    # --- residual: Conv1d(k=1)->BN (matmul already fused above), or identity ---
    if has_shortcut:
        asc, bsc = bn_affine(ysc, gs_ref[...], bes_ref[...])
        res = ysc * asc + bsc
    else:
        res = x.astype(jnp.float32)

    out_ref[...] = jnp.maximum(y2 * a2 + b2 + res, 0.0).astype(out_ref.dtype)


# ------------------------------- wrapper --------------------------------------
def _round_up(a, b):
    return (a + b - 1) // b * b


def postres_forward(x, params, stride=1, compute_dtype=jnp.float32):
    """x: (N, Cin, L) float32; params in PyTorch layouts. Returns (N, Cout, L) float32.

    compute_dtype=jnp.bfloat16 is recommended on v6e/v7x (halves MXU operand bytes;
    accumulation, BN math and the output stay f32).  Keep f32 on v5e (no bf16 VPU).
    """
    # TODO(synk): stride != 1 not implemented.
    assert stride == 1, "only stride=1 is implemented"
    N, Cin, L = x.shape
    Cout = params["w1"].shape[0]
    has_shortcut = (Cin != Cout) or (stride != 1)
    cdt = jnp.dtype(compute_dtype)

    # sublane packing: 8 rows for f32, 16 for bf16; lanes padded to a multiple of 128.
    pack = 32 // cdt.itemsize
    Cin_p = _round_up(Cin, pack)
    Cout_p = _round_up(Cout, pack)
    count = N * L
    Wp = _round_up(count, 128)

    # --- activations: (N, Cin, L) -> lane-dense (Cin_p, Wp) slab (batch folded into lanes)
    xs = jnp.transpose(x, (1, 0, 2)).reshape(Cin, count)
    xs = jnp.pad(xs, ((0, Cin_p - Cin), (0, Wp - count))).astype(cdt)

    # --- weights: PyTorch (Cout, Cin, 3) -> three (Cout_p, Cin_p) tap blocks
    def pad_w(w2d, rows, cols):
        return jnp.pad(w2d, ((0, rows - w2d.shape[0]),
                             (0, cols - w2d.shape[1]))).astype(cdt)

    def split_conv3(w, ci_p):
        return (pad_w(w[:, :, 0], Cout_p, ci_p),   # left tap  (multiplies x[t-1])
                pad_w(w[:, :, 1], Cout_p, ci_p),   # centre tap
                pad_w(w[:, :, 2], Cout_p, ci_p))   # right tap (multiplies x[t+1])

    def pack_bn(g, be):  # pad gamma with 1, beta with 0 -> padded channels stay exactly 0
        g = jnp.pad(g, (0, Cout_p - Cout), constant_values=1.0).reshape(Cout_p, 1)
        be = jnp.pad(be, (0, Cout_p - Cout)).reshape(Cout_p, 1)
        return g.astype(jnp.float32), be.astype(jnp.float32)

    w1l, w1c, w1r = split_conv3(params["w1"], Cin_p)
    w2l, w2c, w2r = split_conv3(params["w2"], Cout_p)
    g1, be1 = pack_bn(params["g1"], params["be1"])
    g2, be2 = pack_bn(params["g2"], params["be2"])

    if has_shortcut:
        # fuse the 1x1 projection into conv1's centre-tap matmul (stack along M dim)
        ws = pad_w(params["ws"][:, :, 0], Cout_p, Cin_p)
        w1c = jnp.concatenate([w1c, ws], axis=0)          # (2*Cout_p, Cin_p)
        gs, bes = pack_bn(params["gs"], params["bes"])
        args = [xs, w1l, w1c, w1r, g1, be1, w2l, w2c, w2r, g2, be2, gs, bes]
    else:
        args = [xs, w1l, w1c, w1r, g1, be1, w2l, w2c, w2r, g2, be2]
    # NOTE: conv biases b1/b2/bs are intentionally NOT passed: a per-channel constant added
    # before training-mode BatchNorm is exactly cancelled by the mean subtraction.

    # VMEM budget: v5e/v6e have 128 MiB per TC, v7x only 64 MiB -> derive, don't hard-code.
    try:
        vmem_cap = pltpu.get_tpu_info().vmem_capacity_bytes
    except Exception:
        vmem_cap = 64 * 1024 * 1024            # conservative fallback (v7x per-TC VMEM)
    vmem_limit = int(min(vmem_cap * 3 // 4, 100 * 1024 * 1024))

    vmem = pl.BlockSpec(memory_space=pltpu.MemorySpace.VMEM)
    out = pl.pallas_call(
        functools.partial(postres_kernel, has_shortcut=has_shortcut, count=count, L=L),
        out_shape=jax.ShapeDtypeStruct((Cout_p, Wp), jnp.float32),
        in_specs=[vmem] * len(args),
        out_specs=vmem,
        compiler_params=pltpu.CompilerParams(vmem_limit_bytes=vmem_limit),
    )(*args)

    # strip channel / lane alignment padding and restore (N, Cout, L)
    out = out[:Cout, :count].reshape(Cout, N, L)
    return jnp.transpose(out, (1, 0, 2))


# --------------------------- pure-JAX reference --------------------------------
def postres_reference(x, params, has_shortcut):
    """Faithful to the PyTorch module (training-mode BN, conv biases included)."""
    def conv1d(x, w, b, pad):
        y = jax.lax.conv_general_dilated(
            x, w, window_strides=(1,), padding=[(pad, pad)],
            dimension_numbers=("NCH", "OIH", "NCH"))
        return y + b[None, :, None]

    def bn(y, g, be):
        mean = jnp.mean(y, axis=(0, 2), keepdims=True)
        var = jnp.mean((y - mean) ** 2, axis=(0, 2), keepdims=True)
        return (y - mean) * jax.lax.rsqrt(var + 1e-5) * g[None, :, None] + be[None, :, None]

    h = jax.nn.relu(bn(conv1d(x, params["w1"], params["b1"], 1),
                       params["g1"], params["be1"]))
    h = bn(conv1d(h, params["w2"], params["b2"], 1), params["g2"], params["be2"])
    if has_shortcut:
        res = bn(conv1d(x, params["ws"], params["bs"], 0), params["gs"], params["bes"])
    else:
        res = x
    return jax.nn.relu(h + res)


# ------------------------------- main -------------------------------------------
if __name__ == "__main__":
    def make_params(key, c_in, c_out):
        ks = jax.random.split(key, 12)

        def uinit(k, shape, fan_in):
            b = 1.0 / np.sqrt(fan_in)
            return jax.random.uniform(k, shape, jnp.float32, -b, b)

        return {
            "w1": uinit(ks[0], (c_out, c_in, 3), c_in * 3),
            "b1": uinit(ks[1], (c_out,), c_in * 3),
            "g1": jax.random.uniform(ks[2], (c_out,), jnp.float32, 0.5, 1.5),
            "be1": jax.random.uniform(ks[3], (c_out,), jnp.float32, -0.5, 0.5),
            "w2": uinit(ks[4], (c_out, c_out, 3), c_out * 3),
            "b2": uinit(ks[5], (c_out,), c_out * 3),
            "g2": jax.random.uniform(ks[6], (c_out,), jnp.float32, 0.5, 1.5),
            "be2": jax.random.uniform(ks[7], (c_out,), jnp.float32, -0.5, 0.5),
            "ws": uinit(ks[8], (c_out, c_in, 1), c_in),
            "bs": uinit(ks[9], (c_out,), c_in),
            "gs": jax.random.uniform(ks[10], (c_out,), jnp.float32, 0.5, 1.5),
            "bes": jax.random.uniform(ks[11], (c_out,), jnp.float32, -0.5, 0.5),
        }

    key = jax.random.PRNGKey(0)
    k1, k2, k3, k4 = jax.random.split(key, 4)

    # case 1: projection shortcut (Cin != Cout), f32 compute
    N, Cin, Cout, L = 2, 4, 8, 16
    p1 = make_params(k1, Cin, Cout)
    x1 = jax.random.normal(k2, (N, Cin, L), jnp.float32)
    out = jax.block_until_ready(postres_forward(x1, p1))
    ref = jax.block_until_ready(postres_reference(x1, p1, has_shortcut=True))
    np.testing.assert_allclose(np.asarray(out), np.asarray(ref), rtol=1e-3, atol=1e-3)

    # case 1b: same block with bf16 MXU operands (f32 accumulation + f32 BN/elementwise)
    out_bf16 = jax.block_until_ready(
        postres_forward(x1, p1, compute_dtype=jnp.bfloat16))
    np.testing.assert_allclose(np.asarray(out_bf16), np.asarray(ref), rtol=5e-2, atol=5e-2)

    # case 2: identity shortcut (Cin == Cout), also exercises channel padding (6 -> 8)
    N2, C2, L2 = 2, 6, 16
    p2 = make_params(k3, C2, C2)
    x2 = jax.random.normal(k4, (N2, C2, L2), jnp.float32)
    out2 = jax.block_until_ready(postres_forward(x2, p2))
    ref2 = jax.block_until_ready(postres_reference(x2, p2, has_shortcut=False))
    np.testing.assert_allclose(np.asarray(out2), np.asarray(ref2), rtol=1e-3, atol=1e-3)

    print("KERNEL_OK")
</pallas_src>

<mosaic_0001>
module attributes {stable_mosaic.version = 11 : i64} {
  func.func @postres_kernel(%arg0: memref<8x128xf32, #tpu.memory_space<vmem>>, %arg1: memref<8x8xf32, #tpu.memory_space<vmem>>, %arg2: memref<16x8xf32, #tpu.memory_space<vmem>>, %arg3: memref<8x8xf32, #tpu.memory_space<vmem>>, %arg4: memref<8x1xf32, #tpu.memory_space<vmem>>, %arg5: memref<8x1xf32, #tpu.memory_space<vmem>>, %arg6: memref<8x8xf32, #tpu.memory_space<vmem>>, %arg7: memref<8x8xf32, #tpu.memory_space<vmem>>, %arg8: memref<8x8xf32, #tpu.memory_space<vmem>>, %arg9: memref<8x1xf32, #tpu.memory_space<vmem>>, %arg10: memref<8x1xf32, #tpu.memory_space<vmem>>, %arg11: memref<8x1xf32, #tpu.memory_space<vmem>>, %arg12: memref<8x1xf32, #tpu.memory_space<vmem>>, %arg13: memref<8x128xf32, #tpu.memory_space<vmem>>) attributes {dimension_semantics = [], scalar_prefetch = 0 : i64, scratch_operands = 0 : i64, tpu.core_type = #tpu.core_type<tc>} {
    %c0 = arith.constant 0 : index
    %c0_0 = arith.constant 0 : index
    %0 = vector.load %arg0[%c0, %c0_0] : memref<8x128xf32, #tpu.memory_space<vmem>>, vector<8x128xf32>
    %1 = tpu.iota {dimensions = array<i32: 1>} : vector<1x128xi32>
    %c32_i32 = arith.constant 32 : i32
    %2 = vector.broadcast %c32_i32 : i32 to vector<1x128xi32>
    %3 = arith.cmpi slt, %1, %2 : vector<1x128xi32>
    %c16_i32 = arith.constant 16 : i32
    %c0_i32 = arith.constant 0 : i32
    %4 = arith.cmpi eq, %c16_i32, %c0_i32 : i32
    %c1_i32 = arith.constant 1 : i32
    %5 = arith.select %4, %c1_i32, %c16_i32 : i32
    %6 = vector.broadcast %5 : i32 to vector<1x128xi32>
    %7 = arith.remsi %1, %6 : vector<1x128xi32>
    %c0_i32_1 = arith.constant 0 : i32
    %8 = vector.broadcast %c0_i32_1 : i32 to vector<1x128xi32>
    %9 = arith.cmpi ne, %7, %8 : vector<1x128xi32>
    %c0_i32_2 = arith.constant 0 : i32
    %10 = vector.broadcast %c0_i32_2 : i32 to vector<1x128xi32>
    %11 = arith.cmpi slt, %7, %10 : vector<1x128xi32>
    %c0_i32_3 = arith.constant 0 : i32
    %12 = arith.cmpi slt, %5, %c0_i32_3 : i32
    %13 = vector.broadcast %12 : i1 to vector<1x128xi1>
    %14 = vector.broadcast %13 : vector<1x128xi1> to vector<1x128xi1>
    %15 = arith.xori %11, %14 : vector<1x128xi1>
    %16 = arith.andi %15, %9 : vector<1x128xi1>
    %17 = vector.broadcast %5 : i32 to vector<1x128xi32>
    %18 = arith.addi %7, %17 : vector<1x128xi32>
    %19 = arith.select %16, %18, %7 : vector<1x128xi1>, vector<1x128xi32>
    %c0_i32_4 = arith.constant 0 : i32
    %20 = vector.broadcast %c0_i32_4 : i32 to vector<1x128xi32>
    %21 = arith.cmpi ne, %19, %20 : vector<1x128xi32>
    %22 = arith.andi %3, %21 : vector<1x128xi1>
    %c16_i32_5 = arith.constant 16 : i32
    %c0_i32_6 = arith.constant 0 : i32
    %23 = arith.cmpi eq, %c16_i32_5, %c0_i32_6 : i32
    %c1_i32_7 = arith.constant 1 : i32
    %24 = arith.select %23, %c1_i32_7, %c16_i32_5 : i32
    %25 = vector.broadcast %24 : i32 to vector<1x128xi32>
    %26 = arith.remsi %1, %25 : vector<1x128xi32>
    %c0_i32_8 = arith.constant 0 : i32
    %27 = vector.broadcast %c0_i32_8 : i32 to vector<1x128xi32>
    %28 = arith.cmpi ne, %26, %27 : vector<1x128xi32>
    %c0_i32_9 = arith.constant 0 : i32
    %29 = vector.broadcast %c0_i32_9 : i32 to vector<1x128xi32>
    %30 = arith.cmpi slt, %26, %29 : vector<1x128xi32>
    %c0_i32_10 = arith.constant 0 : i32
    %31 = arith.cmpi slt, %24, %c0_i32_10 : i32
    %32 = vector.broadcast %31 : i1 to vector<1x128xi1>
    %33 = vector.broadcast %32 : vector<1x128xi1> to vector<1x128xi1>
    %34 = arith.xori %30, %33 : vector<1x128xi1>
    %35 = arith.andi %34, %28 : vector<1x128xi1>
    %36 = vector.broadcast %24 : i32 to vector<1x128xi32>
    %37 = arith.addi %26, %36 : vector<1x128xi32>
    %38 = arith.select %35, %37, %26 : vector<1x128xi1>, vector<1x128xi32>
    %c15_i32 = arith.constant 15 : i32
    %39 = vector.broadcast %c15_i32 : i32 to vector<1x128xi32>
    %40 = arith.cmpi ne, %38, %39 : vector<1x128xi32>
    %41 = arith.andi %3, %40 : vector<1x128xi1>
    %c1_i32_11 = arith.constant 1 : i32
    %42 = tpu.dynamic_rotate %0 by %c1_i32_11 dim 1 : vector<8x128xf32>, i32 -> vector<8x128xf32>
    %cst = arith.constant 0.000000e+00 : f32
    %43 = vector.shape_cast %22 : vector<1x128xi1> to vector<1x128xi1>
    %44 = vector.broadcast %43 : vector<1x128xi1> to vector<8x128xi1>
    %45 = vector.broadcast %cst : f32 to vector<8x128xf32>
    %46 = arith.select %44, %42, %45 : vector<8x128xi1>, vector<8x128xf32>
    %c127_i32 = arith.constant 127 : i32
    %47 = tpu.dynamic_rotate %0 by %c127_i32 dim 1 : vector<8x128xf32>, i32 -> vector<8x128xf32>
    %cst_12 = arith.constant 0.000000e+00 : f32
    %48 = vector.shape_cast %41 : vector<1x128xi1> to vector<1x128xi1>
    %49 = vector.broadcast %48 : vector<1x128xi1> to vector<8x128xi1>
    %50 = vector.broadcast %cst_12 : f32 to vector<8x128xf32>
    %51 = arith.select %49, %47, %50 : vector<8x128xi1>, vector<8x128xf32>
    %c0_13 = arith.constant 0 : index
    %c0_14 = arith.constant 0 : index
    %52 = vector.load %arg2[%c0_13, %c0_14] : memref<16x8xf32, #tpu.memory_space<vmem>>, vector<16x8xf32>
    %cst_15 = arith.constant dense<0.000000e+00> : vector<16x128xf32>
    %53 = tpu.matmul %52, %0, %cst_15 {dimension_numbers = #tpu.dot_dimension_numbers<[1], [0], [0], [1], [0, 0, 1, 1], [], []>} : vector<16x8xf32>, vector<8x128xf32>, vector<16x128xf32> -> vector<16x128xf32>
    %54 = vector.extract_strided_slice %53 {offsets = [0, 0], sizes = [8, 128], strides = [1, 1]} : vector<16x128xf32> to vector<8x128xf32>
    %55 = vector.extract_strided_slice %53 {offsets = [8, 0], sizes = [8, 128], strides = [1, 1]} : vector<16x128xf32> to vector<8x128xf32>
    %c0_16 = arith.constant 0 : index
    %c0_17 = arith.constant 0 : index
    %56 = vector.load %arg1[%c0_16, %c0_17] : memref<8x8xf32, #tpu.memory_space<vmem>>, vector<8x8xf32>
    %cst_18 = arith.constant dense<0.000000e+00> : vector<8x128xf32>
    %57 = tpu.matmul %56, %46, %cst_18 {dimension_numbers = #tpu.dot_dimension_numbers<[1], [0], [0], [1], [0, 0, 1, 1], [], []>} : vector<8x8xf32>, vector<8x128xf32>, vector<8x128xf32> -> vector<8x128xf32>
    %58 = arith.addf %54, %57 : vector<8x128xf32>
    %c0_19 = arith.constant 0 : index
    %c0_20 = arith.constant 0 : index
    %59 = vector.load %arg3[%c0_19, %c0_20] : memref<8x8xf32, #tpu.memory_space<vmem>>, vector<8x8xf32>
    %cst_21 = arith.constant dense<0.000000e+00> : vector<8x128xf32>
    %60 = tpu.matmul %59, %51, %cst_21 {dimension_numbers = #tpu.dot_dimension_numbers<[1], [0], [0], [1], [0, 0, 1, 1], [], []>} : vector<8x8xf32>, vector<8x128xf32>, vector<8x128xf32> -> vector<8x128xf32>
    %61 = arith.addf %58, %60 : vector<8x128xf32>
    %c0_22 = arith.constant 0 : index
    %c0_23 = arith.constant 0 : index
    %62 = vector.load %arg4[%c0_22, %c0_23] : memref<8x1xf32, #tpu.memory_space<vmem>>, vector<8x1xf32>
    %c0_24 = arith.constant 0 : index
    %c0_25 = arith.constant 0 : index
    %63 = vector.load %arg5[%c0_24, %c0_25] : memref<8x1xf32, #tpu.memory_space<vmem>>, vector<8x1xf32>
    %cst_26 = arith.constant dense<0.000000e+00> : vector<8xf32>
    %64 = vector.multi_reduction <add>, %61, %cst_26 [1] : vector<8x128xf32> to vector<8xf32>
    %65 = vector.shape_cast %64 : vector<8xf32> to vector<8x1xf32>
    %66 = arith.mulf %61, %61 : vector<8x128xf32>
    %cst_27 = arith.constant dense<0.000000e+00> : vector<8xf32>
    %67 = vector.multi_reduction <add>, %66, %cst_27 [1] : vector<8x128xf32> to vector<8xf32>
    %68 = vector.shape_cast %67 : vector<8xf32> to vector<8x1xf32>
    %cst_28 = arith.constant 3.125000e-02 : f32
    %69 = vector.broadcast %cst_28 : f32 to vector<8x1xf32>
    %70 = arith.mulf %65, %69 : vector<8x1xf32>
    %cst_29 = arith.constant 3.125000e-02 : f32
    %71 = vector.broadcast %cst_29 : f32 to vector<8x1xf32>
    %72 = arith.mulf %68, %71 : vector<8x1xf32>
    %73 = arith.mulf %70, %70 : vector<8x1xf32>
    %74 = arith.subf %72, %73 : vector<8x1xf32>
    %cst_30 = arith.constant 0.000000e+00 : f32
    %75 = vector.broadcast %cst_30 : f32 to vector<8x1xf32>
    %76 = arith.maximumf %74, %75 : vector<8x1xf32>
    %cst_31 = arith.constant 9.99999974E-6 : f32
    %77 = vector.broadcast %cst_31 : f32 to vector<8x1xf32>
    %78 = arith.addf %76, %77 : vector<8x1xf32>
    %79 = math.rsqrt %78 : vector<8x1xf32>
    %80 = arith.mulf %62, %79 : vector<8x1xf32>
    %81 = arith.mulf %70, %80 : vector<8x1xf32>
    %82 = arith.subf %63, %81 : vector<8x1xf32>
    %83 = vector.broadcast %80 : vector<8x1xf32> to vector<8x128xf32>
    %84 = arith.mulf %61, %83 : vector<8x128xf32>
    %85 = vector.broadcast %82 : vector<8x1xf32> to vector<8x128xf32>
    %86 = arith.addf %84, %85 : vector<8x128xf32>
    %cst_32 = arith.constant 0.000000e+00 : f32
    %87 = vector.broadcast %cst_32 : f32 to vector<8x128xf32>
    %88 = arith.maximumf %86, %87 : vector<8x128xf32>
    %cst_33 = arith.constant 0.000000e+00 : f32
    %89 = vector.shape_cast %3 : vector<1x128xi1> to vector<1x128xi1>
    %90 = vector.broadcast %89 : vector<1x128xi1> to vector<8x128xi1>
    %91 = vector.broadcast %cst_33 : f32 to vector<8x128xf32>
    %92 = arith.select %90, %88, %91 : vector<8x128xi1>, vector<8x128xf32>
    %c1_i32_34 = arith.constant 1 : i32
    %93 = tpu.dynamic_rotate %92 by %c1_i32_34 dim 1 : vector<8x128xf32>, i32 -> vector<8x128xf32>
    %cst_35 = arith.constant 0.000000e+00 : f32
    %94 = vector.shape_cast %22 : vector<1x128xi1> to vector<1x128xi1>
    %95 = vector.broadcast %94 : vector<1x128xi1> to vector<8x128xi1>
    %96 = vector.broadcast %cst_35 : f32 to vector<8x128xf32>
    %97 = arith.select %95, %93, %96 : vector<8x128xi1>, vector<8x128xf32>
    %c127_i32_36 = arith.constant 127 : i32
    %98 = tpu.dynamic_rotate %92 by %c127_i32_36 dim 1 : vector<8x128xf32>, i32 -> vector<8x128xf32>
    %cst_37 = arith.constant 0.000000e+00 : f32
    %99 = vector.shape_cast %41 : vector<1x128xi1> to vector<1x128xi1>
    %100 = vector.broadcast %99 : vector<1x128xi1> to vector<8x128xi1>
    %101 = vector.broadcast %cst_37 : f32 to vector<8x128xf32>
    %102 = arith.select %100, %98, %101 : vector<8x128xi1>, vector<8x128xf32>
    %c0_38 = arith.constant 0 : index
    %c0_39 = arith.constant 0 : index
    %103 = vector.load %arg7[%c0_38, %c0_39] : memref<8x8xf32, #tpu.memory_space<vmem>>, vector<8x8xf32>
    %cst_40 = arith.constant dense<0.000000e+00> : vector<8x128xf32>
    %104 = tpu.matmul %103, %92, %cst_40 {dimension_numbers = #tpu.dot_dimension_numbers<[1], [0], [0], [1], [0, 0, 1, 1], [], []>} : vector<8x8xf32>, vector<8x128xf32>, vector<8x128xf32> -> vector<8x128xf32>
    %c0_41 = arith.constant 0 : index
    %c0_42 = arith.constant 0 : index
    %105 = vector.load %arg6[%c0_41, %c0_42] : memref<8x8xf32, #tpu.memory_space<vmem>>, vector<8x8xf32>
    %cst_43 = arith.constant dense<0.000000e+00> : vector<8x128xf32>
    %106 = tpu.matmul %105, %97, %cst_43 {dimension_numbers = #tpu.dot_dimension_numbers<[1], [0], [0], [1], [0, 0, 1, 1], [], []>} : vector<8x8xf32>, vector<8x128xf32>, vector<8x128xf32> -> vector<8x128xf32>
    %107 = arith.addf %104, %106 : vector<8x128xf32>
    %c0_44 = arith.constant 0 : index
    %c0_45 = arith.constant 0 : index
    %108 = vector.load %arg8[%c0_44, %c0_45] : memref<8x8xf32, #tpu.memory_space<vmem>>, vector<8x8xf32>
    %cst_46 = arith.constant dense<0.000000e+00> : vector<8x128xf32>
    %109 = tpu.matmul %108, %102, %cst_46 {dimension_numbers = #tpu.dot_dimension_numbers<[1], [0], [0], [1], [0, 0, 1, 1], [], []>} : vector<8x8xf32>, vector<8x128xf32>, vector<8x128xf32> -> vector<8x128xf32>
    %110 = arith.addf %107, %109 : vector<8x128xf32>
    %c0_47 = arith.constant 0 : index
    %c0_48 = arith.constant 0 : index
    %111 = vector.load %arg9[%c0_47, %c0_48] : memref<8x1xf32, #tpu.memory_space<vmem>>, vector<8x1xf32>
    %c0_49 = arith.constant 0 : index
    %c0_50 = arith.constant 0 : index
    %112 = vector.load %arg10[%c0_49, %c0_50] : memref<8x1xf32, #tpu.memory_space<vmem>>, vector<8x1xf32>
    %cst_51 = arith.constant dense<0.000000e+00> : vector<8xf32>
    %113 = vector.multi_reduction <add>, %110, %cst_51 [1] : vector<8x128xf32> to vector<8xf32>
    %114 = vector.shape_cast %113 : vector<8xf32> to vector<8x1xf32>
    %115 = arith.mulf %110, %110 : vector<8x128xf32>
    %cst_52 = arith.constant dense<0.000000e+00> : vector<8xf32>
    %116 = vector.multi_reduction <add>, %115, %cst_52 [1] : vector<8x128xf32> to vector<8xf32>
    %117 = vector.shape_cast %116 : vector<8xf32> to vector<8x1xf32>
    %cst_53 = arith.constant 3.125000e-02 : f32
    %118 = vector.broadcast %cst_53 : f32 to vector<8x1xf32>
    %119 = arith.mulf %114, %118 : vector<8x1xf32>
    %cst_54 = arith.constant 3.125000e-02 : f32
    %120 = vector.broadcast %cst_54 : f32 to vector<8x1xf32>
    %121 = arith.mulf %117, %120 : vector<8x1xf32>
    %122 = arith.mulf %119, %119 : vector<8x1xf32>
    %123 = arith.subf %121, %122 : vector<8x1xf32>
    %cst_55 = arith.constant 0.000000e+00 : f32
    %124 = vector.broadcast %cst_55 : f32 to vector<8x1xf32>
    %125 = arith.maximumf %123, %124 : vector<8x1xf32>
    %cst_56 = arith.constant 9.99999974E-6 : f32
    %126 = vector.broadcast %cst_56 : f32 to vector<8x1xf32>
    %127 = arith.addf %125, %126 : vector<8x1xf32>
    %128 = math.rsqrt %127 : vector<8x1xf32>
    %129 = arith.mulf %111, %128 : vector<8x1xf32>
    %130 = arith.mulf %119, %129 : vector<8x1xf32>
    %131 = arith.subf %112, %130 : vector<8x1xf32>
    %c0_57 = arith.constant 0 : index
    %c0_58 = arith.constant 0 : index
    %132 = vector.load %arg11[%c0_57, %c0_58] : memref<8x1xf32, #tpu.memory_space<vmem>>, vector<8x1xf32>
    %c0_59 = arith.constant 0 : index
    %c0_60 = arith.constant 0 : index
    %133 = vector.load %arg12[%c0_59, %c0_60] : memref<8x1xf32, #tpu.memory_space<vmem>>, vector<8x1xf32>
    %cst_61 = arith.constant dense<0.000000e+00> : vector<8xf32>
    %134 = vector.multi_reduction <add>, %55, %cst_61 [1] : vector<8x128xf32> to vector<8xf32>
    %135 = vector.shape_cast %134 : vector<8xf32> to vector<8x1xf32>
    %136 = arith.mulf %55, %55 : vector<8x128xf32>
    %cst_62 = arith.constant dense<0.000000e+00> : vector<8xf32>
    %137 = vector.multi_reduction <add>, %136, %cst_62 [1] : vector<8x128xf32> to vector<8xf32>
    %138 = vector.shape_cast %137 : vector<8xf32> to vector<8x1xf32>
    %cst_63 = arith.constant 3.125000e-02 : f32
    %139 = vector.broadcast %cst_63 : f32 to vector<8x1xf32>
    %140 = arith.mulf %135, %139 : vector<8x1xf32>
    %cst_64 = arith.constant 3.125000e-02 : f32
    %141 = vector.broadcast %cst_64 : f32 to vector<8x1xf32>
    %142 = arith.mulf %138, %141 : vector<8x1xf32>
    %143 = arith.mulf %140, %140 : vector<8x1xf32>
    %144 = arith.subf %142, %143 : vector<8x1xf32>
    %cst_65 = arith.constant 0.000000e+00 : f32
    %145 = vector.broadcast %cst_65 : f32 to vector<8x1xf32>
    %146 = arith.maximumf %144, %145 : vector<8x1xf32>
    %cst_66 = arith.constant 9.99999974E-6 : f32
    %147 = vector.broadcast %cst_66 : f32 to vector<8x1xf32>
    %148 = arith.addf %146, %147 : vector<8x1xf32>
    %149 = math.rsqrt %148 : vector<8x1xf32>
    %150 = arith.mulf %132, %149 : vector<8x1xf32>
    %151 = arith.mulf %140, %150 : vector<8x1xf32>
    %152 = arith.subf %133, %151 : vector<8x1xf32>
    %153 = vector.broadcast %150 : vector<8x1xf32> to vector<8x128xf32>
    %154 = arith.mulf %55, %153 : vector<8x128xf32>
    %155 = vector.broadcast %152 : vector<8x1xf32> to vector<8x128xf32>
    %156 = arith.addf %154, %155 : vector<8x128xf32>
    %157 = vector.broadcast %129 : vector<8x1xf32> to vector<8x128xf32>
    %158 = arith.mulf %110, %157 : vector<8x128xf32>
    %159 = vector.broadcast %131 : vector<8x1xf32> to vector<8x128xf32>
    %160 = arith.addf %158, %159 : vector<8x128xf32>
    %161 = arith.addf %160, %156 : vector<8x128xf32>
    %cst_67 = arith.constant 0.000000e+00 : f32
    %162 = vector.broadcast %cst_67 : f32 to vector<8x128xf32>
    %163 = arith.maximumf %161, %162 : vector<8x128xf32>
    %c0_68 = arith.constant 0 : index
    %c0_69 = arith.constant 0 : index
    %164 = vector.load %arg13[%c0_68, %c0_69] : memref<8x128xf32, #tpu.memory_space<vmem>>, vector<8x128xf32>
    tpu.vector_store %arg13[%c0_68, %c0_69], %163 {strides = array<i32>} : memref<8x128xf32, #tpu.memory_space<vmem>>, vector<8x128xf32>,
    return
  }
}

</mosaic_0001>

<bundles_post_ra>
// kernel: tpu_custom_call.1
= control target key start
LH: loop header
LB: loop body
LE: loop exit
PB: predicated region body
PF: predicated region fallthrough
CT: control target
= control target key end

     0   :  { %vm77_vm0 = vcmask 64512   ;;  %s743_s14 = smov 1   ;;  %s933_s0 = inlined_call_operand.vmem [shape: f32[8,128], index: 0, kind: input, shape index: {}]   ;;  %s934_s1 = inlined_call_operand.vmem [shape: f32[8,8], index: 1, kind: input, shape index: {}]   ;;  %s935_s2 = inlined_call_operand.vmem [shape: f32[16,8], index: 2, kind: input, shape index: {}]   ;;  %s936_s3 = inlined_call_operand.vmem [shape: f32[8,8], index: 3, kind: input, shape index: {}]   ;;  %s937_s4 = inlined_call_operand.vmem [shape: f32[8,1], index: 4, kind: input, shape index: {}]   ;;  %s938_s5 = inlined_call_operand.vmem [shape: f32[8,1], index: 5, kind: input, shape index: {}]   ;;  %s939_s6 = inlined_call_operand.vmem [shape: f32[8,8], index: 6, kind: input, shape index: {}]   ;;  %s940_s7 = inlined_call_operand.vmem [shape: f32[8,8], index: 7, kind: input, shape index: {}]   ;;  %s941_s8 = inlined_call_operand.vmem [shape: f32[8,8], index: 8, kind: input, shape index: {}]   ;;  %s942_s9 = inlined_call_operand.vmem [shape: f32[8,1], index: 9, kind: input, shape index: {}]   ;;  %s943_s10 = inlined_call_operand.vmem [shape: f32[8,1], index: 10, kind: input, shape index: {}]   ;;  %s944_s11 = inlined_call_operand.vmem [shape: f32[8,1], index: 11, kind: input, shape index: {}]   ;;  %s945_s12 = inlined_call_operand.vmem [shape: f32[8,1], index: 12, kind: input, shape index: {}]   ;;  %s946_s13 = inlined_call_operand.hbm [shape: f32[8,128], index: 13, kind: output, shape index: {}]  }
   0x1   :  { %v45_v0 = vld [vmem:[%s933_s0] sm:$0xff]  ;;  %v76_v2 = vld [vmem:[%s935_s2 + $0x8] sm:$0xff] }
   0x2   :  { %v75_v1 = vld [vmem:[%s935_s2] sm:$0xff]  ;;  %65 = vrot.lane.b32.xlu0 %v45_v0, %s743_s14  ;;  %671 = vmatprep.subr.mxu0 %v45_v0 }
   0x3   :  { %18 = vsyncpa [#allocation3], 0  ;;  %672 = vmatpush3.msra.mxu0 %v45_v0  ;;  %673 = vmatprep.mubr.msk.f32.mxu0 %vm77_vm0, %v75_v1  ;;  %v744_v3 = vmov 0.0   ;;  %vm745_vm1 = vmmov 0   ;;  %s746_s0 = smov 127   ;;  %v46_v4 = vlaneseq  ;;  %v159_v8 = vld [vmem:[%s934_s1] sm:$0xff] }
   0x4   :  { %674 = vmatmul.mubr.msk.f32.vlgmr.msra.gmra.mrb[0].mxu0 %vm77_vm0, %v76_v2  ;;  %676 = vmatprep.subr.mxu0 %v744_v3  ;;  %v234_v11 = vld [vmem:[%s936_s3] sm:$0xff]  ;;  %v747_v22 = vmov 0  }
   0x5   :  { %678 = vmatprep.mubr.msk.f32.mxu0 %vm745_vm1, %v744_v3  ;;  %686 = vmatprep.subr.mxu1 %v744_v3  ;;  %v838_v5 = vand.u32 127, %v46_v4  ;;  %v309_v31 = vld [vmem:[%s937_s4] sm:$0xff] }
   0x6   :  { %70 = vrot.lane.b32.xlu0 %v45_v0, %s746_s0  ;;  %688 = vmatprep.mubr.msk.f32.mxu1 %vm745_vm1, %v744_v3  ;;  %v310_v34 = vld [vmem:[%s938_s5] sm:$0xff] }
   0x7   :  { %v53_v6 = vand.u32 15, %v838_v5  ;;  %vm48_vm2 = vcmp.lt.s32.totalorder %v838_v5, 32  ;;  %711 = vset.pattern.permute.xlu0 %v747_v22  ;;  %712 = vset.pattern.permute.xlu1 %v747_v22  ;;  %v349_v43 = vld [vmem:[%s939_s6] sm:$0xff] }
   0x8   :  { %v348_v45 = vld [vmem:[%s940_s7] sm:$0xff] }
   0x9   :  { %vm61_vm3 = vcmp.ne.s32.totalorder %v53_v6, 0  ;;  %vm63_vm5 = vcmp.ne.s32.totalorder %v53_v6, 15  ;;  %v496_v47 = vld [vmem:[%s941_s8] sm:$0xff] }
   0xa   :  { %vm844_vm4 = vmand %vm48_vm2, %vm61_vm3  ;;  %v571_v4 = vld [vmem:[%s942_s9] sm:$0xff]  ;;  %s748_s9 = smov [#allocation2]  }
   0xb   :  { %vm857_vm6 = vmand %vm48_vm2, %vm63_vm5  ;;  %v588_v7 = vld [vmem:[%s944_s11] sm:$0xff]  ;;  %s638_s11 = sshll.u32 %s748_s9, 4  ;;  %s639_s11 = int_to_ptr.vmem [resolvable:$true] %s638_s11 }
   0xc   :  { %v589_v10 = vld [vmem:[%s945_s12] sm:$0xff]  ;;  %s719_s12 = scalar_lea.vmem %s639_s11, 128  ;;  %p724_p1 = scmp.lt.s32.totalorder %s639_s11, %s639_s11 }
   0xd   :  { %p720_p0 = scmp.ne.s32.totalorder %s639_s11, %s719_s12  ;;  %p725_p2 = scmp.lt.s32.totalorder %s719_s12, %s719_s12 }
   0xf   :  { %p726_p3 = por %p725_p2, %p724_p1 }
  0x11   :  { %p727_p4 = pnand %p726_p3, %p720_p0 }
  0x74   :  { %v66_v9 = vpop.permute.xlu0 %65 }
  0x75   :  { %677 = vmatpush3.msk.msra.mxu0 %vm844_vm4, %v66_v9 }
  0x76   :  { %679 = vmatmul.mubr.msk.f32.vlgmr.msra.gmra.mrb[2].mxu0 %vm77_vm0, %v159_v8  ;;  %681 = vmatprep.subr.mxu0 %v744_v3 }
  0x77   :  { %683 = vmatprep.mubr.msk.f32.mxu0 %vm745_vm1, %v744_v3 }
  0x78   :  { %v71_v12 = vpop.permute.xlu0 %70 }
  0x79   :  { %682 = vmatpush3.msk.msra.mxu0 %vm857_vm6, %v71_v12 }
  0x7a   :  { %684 = vmatmul.mubr.msk.f32.vlgmr.msra.gmra.mrb[4].mxu0 %vm77_vm0, %v234_v11 }
  0xd7   :  { %v869_v13 = vpop.f32.mrb[0].mxu0 }
  0xd8   :  { %v150_v14 = vpop.f32.mrb[1].mxu0  ;;  %v592_v51 = vmul.f32 %v869_v13, %v869_v13 }
 0x149   :  { %v229_v15 = vpop.f32.mrb[2].mxu0 }
 0x14a   :  { %v233_v16 = vadd.f32 %v229_v15, %v150_v14  ;;  %v680_v17 = vpop.f32.mrb[3].mxu0  ;;  %v572_v15 = vld [vmem:[%s943_s10] sm:$0xff] }
 0x14d   :  { %v304_v18 = vpop.f32.mrb[4].mxu0 }
 0x14e   :  { %v308_v19 = vadd.f32 %v304_v18, %v233_v16  ;;  %v685_v20 = vpop.f32.mrb[5].mxu0 }
 0x150   :  { %311 = vadd.xlane.f32.xlu1 %v308_v19  ;;  %v313_v21 = vmul.f32 %v308_v19, %v308_v19 }
 0x154   :  { %314 = vadd.xlane.f32.xlu1 %v313_v21 }
 0x1dd   :  { %v312_v23 = vpop.xlane.xlu1 %311 }
 0x1de   :  { %v316_v24 = vmul.f32 0.03125, %v312_v23 }
 0x1e0   :  { %v318_v26 = vmul.f32 %v316_v24, %v316_v24 }
 0x1e1   :  { %v315_v25 = vpop.xlane.xlu1 %314 }
 0x1e2   :  { %v317_v27 = vmul.f32 0.03125, %v315_v25 }
 0x1e4   :  { %v319_v28 = vsub.f32 %v317_v27, %v318_v26 }
 0x1e6   :  { %v320_v29 = vmax.f32 %v319_v28, 0.0 }
 0x1e8   :  { %v321_v30 = vadd.f32 1e-05, %v320_v29 }
 0x1ea   :  { %713 = vrsqrt.f32 %v321_v30 }
 0x1f4   :  { %v714_v32 = vpop.eup %713 }
 0x1f5   :  { %v323_v33 = vmul.f32 %v714_v32, %v309_v31 }
 0x1f7   :  { %328 = vperm.xlu0 %711, %v323_v33   ;;  %v324_v35 = vmul.f32 %v323_v33, %v316_v24 }
 0x1f9   :  { %v325_v36 = vsub.f32 %v310_v34, %v324_v35 }
 0x1fb   :  { %334 = vperm.xlu1 %712, %v325_v36  }
 0x21f   :  { %590 = vadd.xlane.f32.xlu1 %v869_v13 }
 0x276   :  { %v329_v37 = vpop.permute.xlu0 %328 }
 0x277   :  { %v331_v38 = vmul.f32 %v329_v37, %v308_v19 }
 0x27a   :  { %v335_v39 = vpop.permute.xlu1 %334 }
 0x27b   :  { %v337_v40 = vadd.f32 %v335_v39, %v331_v38 }
 0x27d   :  { %v338_v41 = vmax.f32 %v337_v40, 0.0 }
 0x27f   :  { %v341_v42 = vsel %vm48_vm2, %v338_v41, 0.0 }
 0x280   :  { %342 = vrot.lane.b32.xlu0 %v341_v42, %s743_s14 }
 0x284   :  { %345 = vrot.lane.b32.xlu0 %v341_v42, %s746_s0 }
 0x2ac   :  { %v591_v54 = vpop.xlane.xlu1 %590 }
 0x2ad   :  { %v595_v56 = vmul.f32 0.03125, %v591_v54 }
 0x2af   :  { %v597_v61 = vmul.f32 %v595_v56, %v595_v56 }
 0x2f2   :  { %v343_v44 = vpop.permute.xlu0 %342 }
 0x2f3   :  { %687 = vmatpush3.msk.msra.mxu1 %vm844_vm4, %v343_v44 }
 0x2f4   :  { %689 = vmatmul.mubr.msk.f32.vlgmr.msra.gmra.mrb[0].mxu1 %vm77_vm0, %v349_v43  ;;  %691 = vmatprep.subr.mxu1 %v744_v3 }
 0x2f5   :  { %692 = vmatpush3.msk.msra.mxu1 %vm48_vm2, %v338_v41  ;;  %693 = vmatprep.mubr.msk.f32.mxu1 %vm745_vm1, %v744_v3 }
 0x2f6   :  { %696 = vmatprep.subr.mxu1 %v744_v3  ;;  %v346_v46 = vpop.permute.xlu0 %345 }
 0x2fc   :  { %694 = vmatmul.mubr.msk.f32.vlgmr.msra.gmra.mrb[0].mxu1 %vm77_vm0, %v348_v45 }
 0x2fd   :  { %697 = vmatpush3.msk.msra.mxu1 %vm857_vm6, %v346_v46  ;;  %698 = vmatprep.mubr.msk.f32.mxu1 %vm745_vm1, %v744_v3 }
 0x304   :  { %699 = vmatmul.mubr.msk.f32.vlgmr.msra.gmra.mrb[0].mxu1 %vm77_vm0, %v496_v47 }
 0x3d7   :  { %v566_v48 = vpop.f32.mrb[0].mxu1 }
 0x3d8   :  { %573 = vadd.xlane.f32.xlu0 %v566_v48  ;;  %v700_v49 = vpop.f32.mrb[1].mxu1  ;;  %v575_v50 = vmul.f32 %v566_v48, %v566_v48 }
 0x3dc   :  { %576 = vadd.xlane.f32.xlu0 %v575_v50 }
 0x3e0   :  { %593 = vadd.xlane.f32.xlu0 %v592_v51 }
 0x465   :  { %v574_v52 = vpop.xlane.xlu0 %573 }
 0x466   :  { %v578_v53 = vmul.f32 0.03125, %v574_v52 }
 0x468   :  { %v580_v57 = vmul.f32 %v578_v53, %v578_v53 }
 0x469   :  { %v577_v55 = vpop.xlane.xlu0 %576 }
 0x46a   :  { %v579_v58 = vmul.f32 0.03125, %v577_v55 }
 0x46c   :  { %v581_v59 = vsub.f32 %v579_v58, %v580_v57 }
 0x46d   :  { %v594_v60 = vpop.xlane.xlu0 %593 }
 0x46e   :  { %v582_v62 = vmax.f32 %v581_v59, 0.0  ;;  %v596_v63 = vmul.f32 0.03125, %v594_v60 }
 0x470   :  { %v583_v0 = vadd.f32 1e-05, %v582_v62  ;;  %v598_v1 = vsub.f32 %v596_v63, %v597_v61 }
 0x472   :  { %715 = vrsqrt.f32 %v583_v0  ;;  %v599_v2 = vmax.f32 %v598_v1, 0.0 }
 0x474   :  { %v600_v3 = vadd.f32 1e-05, %v599_v2 }
 0x476   :  { %717 = vrsqrt.f32 %v600_v3 }
 0x47c   :  { %v716_v5 = vpop.eup %715 }
 0x47d   :  { %v585_v6 = vmul.f32 %v716_v5, %v571_v4 }
 0x47f   :  { %619 = vperm.xlu0 %711, %v585_v6   ;;  %v586_v14 = vmul.f32 %v585_v6, %v578_v53 }
 0x480   :  { %v718_v8 = vpop.eup %717 }
 0x481   :  { %v602_v9 = vmul.f32 %v718_v8, %v588_v7  ;;  %v587_v16 = vsub.f32 %v572_v15, %v586_v14 }
 0x483   :  { %607 = vperm.xlu1 %712, %v602_v9   ;;  %v603_v11 = vmul.f32 %v602_v9, %v595_v56 }
 0x485   :  { %v604_v12 = vsub.f32 %v589_v10, %v603_v11 }
 0x487   :  { %613 = vperm.xlu1 %712, %v604_v12  }
 0x48b   :  { %625 = vperm.xlu1 %712, %v587_v16  }
 0x4fe   :  { %v620_v18 = vpop.permute.xlu0 %619 }
 0x4ff   :  { %v622_v20 = vmul.f32 %v620_v18, %v566_v48 }
 0x502   :  { %v608_v17 = vpop.permute.xlu1 %607 }
 0x503   :  { %v610_v21 = vmul.f32 %v869_v13, %v608_v17 }
 0x506   :  { %v614_v19 = vpop.permute.xlu1 %613 }
 0x507   :  { %v616_v23 = vadd.f32 %v614_v19, %v610_v21 }
 0x50a   :  { %v626_v22 = vpop.permute.xlu1 %625 }
 0x50b   :  { %v628_v24 = vadd.f32 %v626_v22, %v622_v20 }
 0x50d   :  { %v629_v25 = vadd.f32 %v628_v24, %v616_v23 }
 0x50f   :  { %v630_v26 = vmax.f32 %v629_v25, 0.0 }
 0x511   :  { %631 = vst [vmem:[#allocation2] sm:$0xff] %v630_v26 }
 0x512   :  { %730 = shalt.err (!%p727_p4)
}
 0x513   :  { %s731_s30 = scalar_lea.hbm %s946_s13, 128 }
 0x514   :  { %p732_p5 = scmp.ne.s32.totalorder %s946_s13, %s731_s30  ;;  %p735_p6 = scmp.lt.u32.totalorder %s731_s30, %s946_s13 }
 0x516   :  { %p737_p7 = pnand %p735_p6, %p732_p5 }
 0x518   :  { %740 = shalt.err (!%p737_p7)
}
 0x519   :  { %641 = dma.vmem_to_hbm [thread:$0]  %s639_s11, 128, %s946_s13, [#allocation3]  }
 0x51a   :  { %741 = dma.done.wait [#allocation3], 128  }
 0x51b   :  { %742 = vsyncadd [#allocation3], 4294967168 }
 0x51c   :  { %645 = vsyncpa [#allocation3], 1 }

</bundles_post_ra>
